<compile_context>
chip_gen: v7x
topology: tpu7x:2x2x1
jax: 0.10.0
libtpu: 0.0.40
codegen_flags: <defaults>
</compile_context>

<pallas_src>
import functools

import jax
import jax.numpy as jnp
from jax.experimental import pallas as pl
from jax.experimental.pallas import tpu as pltpu


def _apply_act(y, act):
    """Activation in f32 on the already-accumulated result."""
    if act == "leakyrelu":
        return jnp.where(y >= 0, y, 0.01 * y)          # nn.LeakyReLU default slope
    elif act == "relu":
        return jnp.maximum(y, 0.0)
    elif act == "sigmoid":
        # exact sigmoid via one EUP push (tanh) + one VPU FMA; no approx-recip drift
        return 0.5 * jnp.tanh(0.5 * y) + 0.5
    elif act == "softplus":
        return jnp.logaddexp(y, 0.0)                    # nn.Softplus default beta=1
    elif act == "None":
        return y
    else:
        raise ValueError(f"bad activation function: {act}")


def _mlp_fused_kernel(*refs, num_layers, activ, end_activ, compute_dtype,
                      last_is_vec):
    """refs = (x_t, w0, b0, w1, b1, ..., w_{L-1}, b_{L-1}, out_t).

    Transposed dataflow: features on sublanes, batch tile (tm) on lanes.
    Hidden matmuls: (N_i, K_i) @ (K_i, tm) on the MXU (bf16 operands, f32 acc).
    """
    xt_ref = refs[0]
    o_ref = refs[-1]
    p = refs[1:-1]

    h = xt_ref[...].astype(jnp.float32)                 # (K0, tm)
    for i in range(num_layers - 1):
        w = p[2 * i][...]                               # (N_i, K_i), compute_dtype
        b = p[2 * i + 1][...]                           # (N_i, 1), f32 lane-broadcast
        h = jnp.dot(w, h.astype(compute_dtype),
                    preferred_element_type=jnp.float32)
        h = _apply_act(h + b, activ)

    w_last = p[-2][...]
    b_last = p[-1][...]
    if last_is_vec:
        # Final out-width == 1: VPU multiply + XLU sublane reduction -> (1, tm)
        # instead of a 1/8-sublane-utilized MXU pass.  w_last is a (K,1) column.
        y = jnp.sum(h * w_last, axis=0, keepdims=True) + b_last
    else:
        y = jnp.dot(w_last, h.astype(compute_dtype),
                    preferred_element_type=jnp.float32) + b_last
    y = _apply_act(y, end_activ)
    o_ref[...] = y.astype(o_ref.dtype)                  # lane-dense store


def _vmem_capacity_bytes():
    """Per-TC VMEM capacity; conservative fallback = v7x's 64 MiB."""
    try:
        cap = getattr(pltpu.get_tpu_info(), "vmem_capacity_bytes", None)
        if cap:
            return int(cap)
    except Exception:
        pass
    return 64 * 1024 * 1024


def _padded_bytes(shape, dtype):
    """VMEM footprint: last dim pads to 128 lanes, second-last to the dtype's
    sublane multiple (8 for 32-bit, 16 for bf16, ...)."""
    itemsize = jnp.dtype(dtype).itemsize
    sub = 8 * max(1, 4 // itemsize)
    shape = tuple(int(d) for d in shape)
    if len(shape) == 1:
        shape = (1,) + shape
    rows = -(-shape[-2] // sub) * sub
    cols = -(-shape[-1] // 128) * 128
    lead = 1
    for d in shape[:-2]:
        lead *= d
    return lead * rows * cols * itemsize


def _pick_batch_tile(M, batch_tile):
    """Largest useful lane-aligned batch tile.  Ensures >=2 grid steps whenever
    M > 128 so dimension_semantics=('parallel',) actually feeds both v7x TCs."""
    if M <= 128:
        return M                               # single block (lane dim == full dim)
    half = ((pl.cdiv(M, 2) + 127) // 128) * 128   # >=2 steps, 128-lane aligned
    return int(min(batch_tile, half))


def mlp_forward(params, x, activ="leakyrelu", end_activ="sigmoid",
                *, compute_dtype=jnp.bfloat16, batch_tile=4096):
    """Reproduces MLP.forward: hidden layers use `activ`, the final layer uses
    `end_activ`, then squeeze(1).  Whole network runs in a single pallas_call.

    Note: hidden matmuls intentionally run in bfloat16 on the MXU (f32
    accumulation); with fan-ins of 16/32 this stays well within ~1e-2 of the
    pure-f32 PyTorch forward."""
    num_layers = len(params)
    M, K0 = x.shape
    N_last = params[-1][0].shape[1]
    last_is_vec = (N_last == 1)

    tm = _pick_batch_tile(M, batch_tile)
    grid = (pl.cdiv(M, tm),)

    # Transposed dataflow: batch on lanes (layout plumbing done once in XLA).
    xt = x.T                                             # (K0, M)
    flat_inputs = [xt]
    in_specs = [pl.BlockSpec((K0, tm), lambda i: (0, i))]
    for li, (w, b) in enumerate(params):                 # w: (K_i, N_i), b: (N_i,)
        is_last = li == num_layers - 1
        if is_last and last_is_vec:
            w_in = w.astype(jnp.float32)                 # (K_last, 1) column, VPU/XLU path
        else:
            w_in = w.T.astype(compute_dtype)             # (N_i, K_i) for W @ h^T
        b_in = b.reshape(-1, 1).astype(jnp.float32)      # (N_i, 1)
        flat_inputs += [w_in, b_in]
        # constant block index -> weights/biases stay VMEM-resident across the grid
        # TODO(synk): mark these pipeline_mode=pl.Buffered(1) to drop the redundant
        # second buffer once single-buffered constant blocks are verified supported.
        in_specs += [pl.BlockSpec(w_in.shape, lambda i: (0, 0)),
                     pl.BlockSpec(b_in.shape, lambda i: (0, 0))]

    out_shape = jax.ShapeDtypeStruct((N_last, M), x.dtype)
    out_specs = pl.BlockSpec((N_last, tm), lambda i: (0, i))

    # VMEM budget: double-buffered x/out tiles + resident params + f32
    # intermediates, all with (sublane, 128-lane) padding, clamped to <=75% of
    # the queried physical VMEM (~48 MiB on v7x, ~96 MiB on v5e/v6e).
    est = 2 * _padded_bytes((K0, tm), x.dtype)                   # x^T tile, 2 bufs
    est += 2 * _padded_bytes((N_last, tm), x.dtype)              # out tile, 2 bufs
    est += 2 * sum(_padded_bytes(a.shape, a.dtype) for a in flat_inputs[1:])
    est += _padded_bytes((K0, tm), jnp.float32)                  # f32 input copy
    for (w, _) in params:
        est += _padded_bytes((w.shape[1], tm), jnp.float32)      # f32 intermediates
    cap = _vmem_capacity_bytes()
    vmem_limit = int(min(max(2 * est, 32 * 1024 * 1024), (3 * cap) // 4))

    kernel = functools.partial(
        _mlp_fused_kernel, num_layers=num_layers, activ=activ,
        end_activ=end_activ, compute_dtype=compute_dtype,
        last_is_vec=last_is_vec)

    out_t = pl.pallas_call(
        kernel,
        out_shape=out_shape,
        grid=grid,
        in_specs=in_specs,
        out_specs=out_specs,
        compiler_params=pltpu.CompilerParams(
            dimension_semantics=("parallel",),   # shard batch blocks across TCs
            vmem_limit_bytes=vmem_limit),
    )(*flat_inputs)

    # PyTorch forward ends with x.squeeze(1)
    return out_t[0] if last_is_vec else out_t.T


def init_mlp_params(key, num_neurons):
    """Deterministic init matching nn.Linear's default U(-1/sqrt(in), 1/sqrt(in)).
    Weights stored as (in, out) = transposed PyTorch layout."""
    params = []
    for i in range(len(num_neurons) - 1):
        fan_in, fan_out = num_neurons[i], num_neurons[i + 1]
        key, kw, kb = jax.random.split(key, 3)
        bound = 1.0 / (fan_in ** 0.5)
        w = jax.random.uniform(kw, (fan_in, fan_out), jnp.float32, -bound, bound)
        b = jax.random.uniform(kb, (fan_out,), jnp.float32, -bound, bound)
        params.append((w, b))
    return params


def _mlp_reference(params, x, activ="leakyrelu", end_activ="sigmoid"):
    """Pure-JAX f32 reference of the PyTorch forward pass."""
    def act(y, a):
        if a == "leakyrelu":
            return jnp.where(y >= 0, y, 0.01 * y)
        if a == "relu":
            return jnp.maximum(y, 0.0)
        if a == "sigmoid":
            return jax.nn.sigmoid(y)
        if a == "softplus":
            return jax.nn.softplus(y)
        return y
    n = len(params)
    h = x
    for i, (w, b) in enumerate(params):
        h = h @ w + b
        h = act(h, end_activ if i == n - 1 else activ)
    return jnp.squeeze(h, axis=1) if h.shape[1] == 1 else h


# TODO(synk): freeze()/activate() (requires_grad toggles) and the optional
# xavier init are training-time concerns with no forward-pass kernel analog.

if __name__ == "__main__":
    num_neurons = [16, 32, 32, 1]   # small MLP; final width 1 -> squeeze(1)

    key = jax.random.PRNGKey(0)
    key, kx = jax.random.split(key)
    params = init_mlp_params(key, num_neurons)

    # small smoke test: single block, grid=(1,)
    batch = 8
    x = jax.random.normal(kx, (batch, num_neurons[0]), dtype=jnp.float32)
    out = jax.block_until_ready(mlp_forward(params, x,
                                            activ="leakyrelu",
                                            end_activ="sigmoid"))
    assert out.shape == (batch,), out.shape
    ref = _mlp_reference(params, x)
    assert jnp.allclose(out, ref, atol=5e-2, rtol=5e-2), (out, ref)

    # gridded path: 2 lane-aligned batch blocks (both TCs on v7x), lane-dense stores
    key, kx2 = jax.random.split(key)
    x2 = jax.random.normal(kx2, (512, num_neurons[0]), dtype=jnp.float32)
    out2 = jax.block_until_ready(mlp_forward(params, x2))
    assert out2.shape == (512,), out2.shape
    ref2 = _mlp_reference(params, x2)
    assert jnp.allclose(out2, ref2, atol=5e-2, rtol=5e-2)

    print("KERNEL_OK")
</pallas_src>

<mosaic_0001>
module attributes {stable_mosaic.version = 11 : i64} {
  func.func @_mlp_fused_kernel(%arg0: i32, %arg1: memref<16x8xf32, #tpu.memory_space<vmem>>, %arg2: memref<32x16xbf16, #tpu.memory_space<vmem>>, %arg3: memref<32x1xf32, #tpu.memory_space<vmem>>, %arg4: memref<32x32xbf16, #tpu.memory_space<vmem>>, %arg5: memref<32x1xf32, #tpu.memory_space<vmem>>, %arg6: memref<32x1xf32, #tpu.memory_space<vmem>>, %arg7: memref<1x1xf32, #tpu.memory_space<vmem>>, %arg8: memref<1x8xf32, #tpu.memory_space<vmem>>) attributes {dimension_semantics = [#tpu.dimension_semantics<parallel>], iteration_bounds = array<i64: 1>, scalar_prefetch = 0 : i64, scratch_operands = 0 : i64, tpu.core_type = #tpu.core_type<tc>, window_params = [{transform_indices = @transform_0, window_bounds = array<i64: 16, 8>}, {pipeline_mode = #tpu.pipeline_mode<synchronous>, transform_indices = @transform_1, window_bounds = array<i64: 32, 16>}, {pipeline_mode = #tpu.pipeline_mode<synchronous>, transform_indices = @transform_2, window_bounds = array<i64: 32, 1>}, {pipeline_mode = #tpu.pipeline_mode<synchronous>, transform_indices = @transform_3, window_bounds = array<i64: 32, 32>}, {pipeline_mode = #tpu.pipeline_mode<synchronous>, transform_indices = @transform_4, window_bounds = array<i64: 32, 1>}, {pipeline_mode = #tpu.pipeline_mode<synchronous>, transform_indices = @transform_5, window_bounds = array<i64: 32, 1>}, {pipeline_mode = #tpu.pipeline_mode<synchronous>, transform_indices = @transform_6, window_bounds = array<i64: 1, 1>}, {transform_indices = @transform_7, window_bounds = array<i64: 1, 8>}]} {
    %c0 = arith.constant 0 : index
    %c0_0 = arith.constant 0 : index
    %0 = vector.load %arg1[%c0, %c0_0] : memref<16x8xf32, #tpu.memory_space<vmem>>, vector<16x8xf32>
    %c0_1 = arith.constant 0 : index
    %c0_2 = arith.constant 0 : index
    %1 = vector.load %arg2[%c0_1, %c0_2] : memref<32x16xbf16, #tpu.memory_space<vmem>>, vector<32x16xbf16>
    %c0_3 = arith.constant 0 : index
    %c0_4 = arith.constant 0 : index
    %2 = vector.load %arg3[%c0_3, %c0_4] : memref<32x1xf32, #tpu.memory_space<vmem>>, vector<32x1xf32>
    %3 = arith.truncf %0 : vector<16x8xf32> to vector<16x8xbf16>
    %cst = arith.constant dense<0.000000e+00> : vector<32x8xf32>
    %4 = tpu.matmul %1, %3, %cst {dimension_numbers = #tpu.dot_dimension_numbers<[1], [0], [0], [1], [0, 0, 1, 1], [], []>} : vector<32x16xbf16>, vector<16x8xbf16>, vector<32x8xf32> -> vector<32x8xf32>
    %5 = vector.broadcast %2 : vector<32x1xf32> to vector<32x8xf32>
    %6 = arith.addf %4, %5 : vector<32x8xf32>
    %cst_5 = arith.constant 0.000000e+00 : f32
    %7 = vector.broadcast %cst_5 : f32 to vector<32x8xf32>
    %8 = arith.cmpf oge, %6, %7 : vector<32x8xf32>
    %cst_6 = arith.constant 0.00999999977 : f32
    %9 = vector.broadcast %cst_6 : f32 to vector<32x8xf32>
    %10 = arith.mulf %9, %6 : vector<32x8xf32>
    %11 = arith.select %8, %6, %10 : vector<32x8xi1>, vector<32x8xf32>
    %c0_7 = arith.constant 0 : index
    %c0_8 = arith.constant 0 : index
    %12 = vector.load %arg4[%c0_7, %c0_8] : memref<32x32xbf16, #tpu.memory_space<vmem>>, vector<32x32xbf16>
    %c0_9 = arith.constant 0 : index
    %c0_10 = arith.constant 0 : index
    %13 = vector.load %arg5[%c0_9, %c0_10] : memref<32x1xf32, #tpu.memory_space<vmem>>, vector<32x1xf32>
    %14 = arith.truncf %11 : vector<32x8xf32> to vector<32x8xbf16>
    %cst_11 = arith.constant dense<0.000000e+00> : vector<32x8xf32>
    %15 = tpu.matmul %12, %14, %cst_11 {dimension_numbers = #tpu.dot_dimension_numbers<[1], [0], [0], [1], [0, 0, 1, 1], [], []>} : vector<32x32xbf16>, vector<32x8xbf16>, vector<32x8xf32> -> vector<32x8xf32>
    %16 = vector.broadcast %13 : vector<32x1xf32> to vector<32x8xf32>
    %17 = arith.addf %15, %16 : vector<32x8xf32>
    %cst_12 = arith.constant 0.000000e+00 : f32
    %18 = vector.broadcast %cst_12 : f32 to vector<32x8xf32>
    %19 = arith.cmpf oge, %17, %18 : vector<32x8xf32>
    %cst_13 = arith.constant 0.00999999977 : f32
    %20 = vector.broadcast %cst_13 : f32 to vector<32x8xf32>
    %21 = arith.mulf %20, %17 : vector<32x8xf32>
    %22 = arith.select %19, %17, %21 : vector<32x8xi1>, vector<32x8xf32>
    %c0_14 = arith.constant 0 : index
    %c0_15 = arith.constant 0 : index
    %23 = vector.load %arg6[%c0_14, %c0_15] : memref<32x1xf32, #tpu.memory_space<vmem>>, vector<32x1xf32>
    %c0_16 = arith.constant 0 : index
    %c0_17 = arith.constant 0 : index
    %24 = vector.load %arg7[%c0_16, %c0_17] : memref<1x1xf32, #tpu.memory_space<vmem>>, vector<1x1xf32>
    %25 = vector.broadcast %23 : vector<32x1xf32> to vector<32x8xf32>
    %26 = arith.mulf %22, %25 : vector<32x8xf32>
    %cst_18 = arith.constant dense<0.000000e+00> : vector<8xf32>
    %27 = vector.multi_reduction <add>, %26, %cst_18 [0] : vector<32x8xf32> to vector<8xf32>
    %28 = vector.shape_cast %27 : vector<8xf32> to vector<1x8xf32>
    %29 = vector.broadcast %24 : vector<1x1xf32> to vector<1x8xf32>
    %30 = arith.addf %28, %29 : vector<1x8xf32>
    %cst_19 = arith.constant 5.000000e-01 : f32
    %31 = vector.broadcast %cst_19 : f32 to vector<1x8xf32>
    %32 = arith.mulf %31, %30 : vector<1x8xf32>
    %33 = math.tanh %32 : vector<1x8xf32>
    %cst_20 = arith.constant 5.000000e-01 : f32
    %34 = vector.broadcast %cst_20 : f32 to vector<1x8xf32>
    %35 = arith.mulf %34, %33 : vector<1x8xf32>
    %cst_21 = arith.constant 5.000000e-01 : f32
    %36 = vector.broadcast %cst_21 : f32 to vector<1x8xf32>
    %37 = arith.addf %35, %36 : vector<1x8xf32>
    %c0_22 = arith.constant 0 : index
    %c0_23 = arith.constant 0 : index
    %38 = vector.load %arg8[%c0_22, %c0_23] : memref<1x8xf32, #tpu.memory_space<vmem>>, vector<1x8xf32>
    tpu.vector_store %arg8[%c0_22, %c0_23], %37 {strides = array<i32>} : memref<1x8xf32, #tpu.memory_space<vmem>>, vector<1x8xf32>,
    return
  }
  func.func @transform_0(%arg0: i32) -> (i32, i32) {
    %c0_i32 = arith.constant 0 : i32
    %c0_i32_0 = arith.constant 0 : i32
    return %c0_i32, %arg0 : i32, i32
  }
  func.func @transform_1(%arg0: i32) -> (i32, i32) {
    %c0_i32 = arith.constant 0 : i32
    %c0_i32_0 = arith.constant 0 : i32
    %c0_i32_1 = arith.constant 0 : i32
    return %c0_i32, %c0_i32_0 : i32, i32
  }
  func.func @transform_2(%arg0: i32) -> (i32, i32) {
    %c0_i32 = arith.constant 0 : i32
    %c0_i32_0 = arith.constant 0 : i32
    %c0_i32_1 = arith.constant 0 : i32
    return %c0_i32, %c0_i32_0 : i32, i32
  }
  func.func @transform_3(%arg0: i32) -> (i32, i32) {
    %c0_i32 = arith.constant 0 : i32
    %c0_i32_0 = arith.constant 0 : i32
    %c0_i32_1 = arith.constant 0 : i32
    return %c0_i32, %c0_i32_0 : i32, i32
  }
  func.func @transform_4(%arg0: i32) -> (i32, i32) {
    %c0_i32 = arith.constant 0 : i32
    %c0_i32_0 = arith.constant 0 : i32
    %c0_i32_1 = arith.constant 0 : i32
    return %c0_i32, %c0_i32_0 : i32, i32
  }
  func.func @transform_5(%arg0: i32) -> (i32, i32) {
    %c0_i32 = arith.constant 0 : i32
    %c0_i32_0 = arith.constant 0 : i32
    %c0_i32_1 = arith.constant 0 : i32
    return %c0_i32, %c0_i32_0 : i32, i32
  }
  func.func @transform_6(%arg0: i32) -> (i32, i32) {
    %c0_i32 = arith.constant 0 : i32
    %c0_i32_0 = arith.constant 0 : i32
    %c0_i32_1 = arith.constant 0 : i32
    return %c0_i32, %c0_i32_0 : i32, i32
  }
  func.func @transform_7(%arg0: i32) -> (i32, i32) {
    %c0_i32 = arith.constant 0 : i32
    %c0_i32_0 = arith.constant 0 : i32
    return %c0_i32, %arg0 : i32, i32
  }
}

</mosaic_0001>

<bundles_post_ra>
// kernel: tpu_custom_call.1
= control target key start
LH: loop header
LB: loop body
LE: loop exit
PB: predicated region body
PF: predicated region fallthrough
CT: control target
= control target key end

     0   :  { %s498_s0 = inlined_call_operand.vmem [shape: f32[16,8], index: 0, kind: input, shape index: {}]   ;;  %s499_s1 = inlined_call_operand.vmem [shape: bf16[32,16], index: 1, kind: input, shape index: {}]   ;;  %s500_s2 = inlined_call_operand.vmem [shape: f32[32,1], index: 2, kind: input, shape index: {}]   ;;  %s501_s3 = inlined_call_operand.vmem [shape: bf16[32,32], index: 3, kind: input, shape index: {}]   ;;  %s502_s4 = inlined_call_operand.vmem [shape: f32[32,1], index: 4, kind: input, shape index: {}]   ;;  %s503_s5 = inlined_call_operand.vmem [shape: f32[32,1], index: 5, kind: input, shape index: {}]   ;;  %s504_s6 = inlined_call_operand.<no memory space> [shape: f32[1,1], index: 6, kind: input, shape index: {}]   ;;  %s505_s7 = inlined_call_operand.hbm [shape: f32[1,8], index: 7, kind: output, shape index: {}]  }
   0x1   :  { %v12_v0 = vstv %s504_s6 }
   0x2   :  { %13 = vst [vmem:[#allocation2] sm:$0x1] %v12_v0 }
   0x3   :  { %v30_v1 = vld [vmem:[%s498_s0] sm:$0xff]  ;;  %v31_v2 = vld [vmem:[%s498_s0 + $0x8] sm:$0xff]  ;;  %vm71_vm0 = vcmask 130048   ;;  %v383_v5 = vmov 0   ;;  %v38_v8 = vld [vmem:[%s500_s2 + $0x10] sm:$0xff] }
   0x4   :  { %v40_v3 = vpack.c.bf16 %v31_v2, %v30_v1  ;;  %v353_v4 = vld [vmem:[%s499_s1] sm:$0xff]   ;;  %351 = vset.pattern.permute.xlu0 %v383_v5  ;;  %352 = vset.pattern.permute.xlu1 %v383_v5  ;;  %v354_v7 = vld [vmem:[%s499_s1 + $0x8] sm:$0xff]   ;;  %v39_v10 = vld [vmem:[%s500_s2 + $0x18] sm:$0xff] }
   0x5   :  { %v36_v6 = vld [vmem:[%s500_s2] sm:$0xff]  ;;  %337 = vmatprep.mubr.msk.bf16.mxu0 %vm71_vm0, %v353_v4  ;;  %v37_v9 = vld [vmem:[%s500_s2 + $0x8] sm:$0xff]  ;;  %53 = vperm.xlu1 %352, %v38_v8  }
   0x6   :  { %335 = vmatprep.subr.bf16.mxu0 %v40_v3  ;;  %43 = vperm.xlu0 %351, %v36_v6  }
   0x7   :  { %336 = vmatpush3.bf16.msra.mxu0 %v40_v3 }
   0xa   :  { %338 = vmatmul.mubr.msk.bf16.vlgmr.msra.gmra.mrb[0].mxu0 %vm71_vm0, %v354_v7  ;;  %48 = vperm.xlu0 %351, %v37_v9  }
   0xb   :  { %14 = vsyncpa [#allocation4], 0  ;;  %v143_v11 = vld [vmem:[%s502_s4] sm:$0xff]  ;;  %58 = vperm.xlu1 %352, %v39_v10   ;;  %v144_v12 = vld [vmem:[%s502_s4 + $0x8] sm:$0xff]  ;;  %vm179_vm1 = vcmask 261120   ;;  %vm276_vm10 = vcmask 64512  }
   0xc   :  { %v145_v13 = vld [vmem:[%s502_s4 + $0x10] sm:$0xff]  ;;  %v146_v14 = vld [vmem:[%s502_s4 + $0x18] sm:$0xff]  ;;  %v247_v15 = vld [vmem:[%s503_s5] sm:$0xff]  ;;  %vm304_vm11 = vcmask 57344  }
   0xd   :  { %v248_v16 = vld [vmem:[%s503_s5 + $0x8] sm:$0xff]  ;;  %v249_v17 = vld [vmem:[%s503_s5 + $0x10] sm:$0xff]  ;;  %v250_v18 = vld [vmem:[%s503_s5 + $0x18] sm:$0xff] }
   0xe   :  { %151 = vperm.xlu0 %351, %v143_v11   ;;  %v251_v19 = vld [vmem:[#allocation2] sm:$0x1]  ;;  %v356_v43 = vld [vmem:[%s501_s3 + $0x8] sm:$0xff]  }
   0xf   :  { %156 = vperm.xlu1 %352, %v144_v12   ;;  %v355_v20 = vld [vmem:[%s501_s3] sm:$0xff]   ;;  %s384_s3 = smov [#allocation3]  }
  0x10   :  { %345 = vmatprep.mubr.msk.bf16.mxu1 %vm179_vm1, %v355_v20  ;;  %s312_s6 = sshll.u32 %s384_s3, 4  ;;  %s313_s6 = int_to_ptr.vmem [resolvable:$true] %s312_s6 }
  0x11   :  { %s359_s10 = scalar_lea.vmem %s313_s6, 16  ;;  %s363_s11 = scalar_lea.vmem %s313_s6, 32 }
  0x12   :  { %161 = vperm.xlu0 %351, %v145_v13   ;;  %p360_p0 = scmp.ne.s32.totalorder %s313_s6, %s359_s10  ;;  %p364_p1 = scmp.lt.s32.totalorder %s313_s6, %s313_s6 }
  0x13   :  { %166 = vperm.xlu1 %352, %v146_v14   ;;  %v295_v14 = vlaneseq  ;;  %p365_p2 = scmp.lt.s32.totalorder %s363_s11, %s359_s10 }
  0x15   :  { %p366_p3 = por %p365_p2, %p364_p1 }
  0x16   :  { %254 = vperm.xlu0 %351, %v247_v15  }
  0x17   :  { %259 = vperm.xlu1 %352, %v248_v16   ;;  %p367_p4 = pnand %p366_p3, %p360_p0 }
  0x1a   :  { %264 = vperm.xlu0 %351, %v249_v17   ;;  %v296_v17 = vshrl.u32 %v295_v14, 7 }
  0x1b   :  { %269 = vperm.xlu1 %352, %v250_v18  }
  0x1c   :  { %v297_v20 = vsub.s32 0, %v296_v17 }
  0x1e   :  { %292 = vperm.xlu0 %351, %v251_v19  }
  0x84   :  { %v54_v21 = vpop.permute.xlu1 %53 }
  0x85   :  { %v44_v22 = vpop.permute.xlu0 %43 }
  0x89   :  { %v49_v29 = vpop.permute.xlu0 %48 }
  0x8a   :  { %v59_v26 = vpop.permute.xlu1 %58 }
  0x8d   :  { %v152_v44 = vpop.permute.xlu0 %151 }
  0x8e   :  { %v157_v45 = vpop.permute.xlu1 %156 }
  0x91   :  { %v162_v46 = vpop.permute.xlu0 %161 }
  0x92   :  { %v167_v47 = vpop.permute.xlu1 %166 }
  0x95   :  { %v255_v51 = vpop.permute.xlu0 %254 }
  0x96   :  { %v260_v57 = vpop.permute.xlu1 %259 }
  0x99   :  { %v265_v1 = vpop.permute.xlu0 %264 }
  0x9a   :  { %v270_v6 = vpop.permute.xlu1 %269 }
  0xdd   :  { %v339_v23 = vpop.f32.mrb[0].mxu0 }
  0xde   :  { %v121_v24 = vadd.f32 %v339_v23, %v54_v21  ;;  %v112_v25 = vpop.f32.mrb[1].mxu0 }
  0xdf   :  { %v113_v27 = vadd.f32 %v112_v25, %v44_v22  ;;  %v340_v28 = vpop.f32.mrb[2].mxu0  ;;  %v293_v22 = vpop.permute.xlu0 %292 }
  0xe0   :  { %v133_v30 = vmul.f32 0.01, %v121_v24  ;;  %v124_v31 = vadd.f32 %v340_v28, %v59_v26  ;;  %v115_v32 = vpop.f32.mrb[3].mxu0  ;;  %vm129_vm2 = vcmp.ge.f32.partialorder %v121_v24, 0.0 }
  0xe1   :  { %v131_v33 = vmul.f32 0.01, %v113_v27  ;;  %v116_v34 = vadd.f32 %v115_v32, %v49_v29  ;;  %vm127_vm4 = vcmp.ge.f32.partialorder %v113_v27, 0.0 }
  0xe2   :  { %vm130_vm3 = vcmp.ge.f32.partialorder %v124_v31, 0.0  ;;  %v134_v35 = vmul.f32 0.01, %v124_v31  ;;  %v137_v37 = vsel %vm129_vm2, %v121_v24, %v133_v30  ;;  %v298_v24 = vrot.slane %v293_v22, %v297_v20 }
  0xe3   :  { %v132_v36 = vmul.f32 0.01, %v116_v34  ;;  %vm128_vm5 = vcmp.ge.f32.partialorder %v116_v34, 0.0  ;;  %v135_v39 = vsel %vm127_vm4, %v113_v27, %v131_v33 }
  0xe4   :  { %v138_v38 = vsel %vm130_vm3, %v124_v31, %v134_v35 }
  0xe5   :  { %v136_v40 = vsel %vm128_vm5, %v116_v34, %v132_v36  ;;  %v148_v41 = vpack.c.bf16 %v138_v38, %v137_v37 }
  0xe6   :  { %v147_v42 = vpack.c.bf16 %v136_v40, %v135_v39 }
  0xe8   :  { %341 = vmatprep.subr.bf16.mxu1 %v147_v42 }
  0xe9   :  { %342 = vmatpush3.bf16.msra.mxu1 %v147_v42 }
  0xea   :  { %343 = vmatprep.subr.bf16.mxu1 %v148_v41 }
  0xed   :  { %344 = vmatpush3.bf16.msra.mxu1 %v148_v41 }
  0xf0   :  { %346 = vmatmul.mubr.msk.bf16.vlgmr.msra.gmra.mrb[0].mxu1 %vm179_vm1, %v356_v43 }
 0x1c3   :  { %v347_v48 = vpop.f32.mrb[0].mxu1 }
 0x1c4   :  { %v229_v49 = vadd.f32 %v347_v48, %v162_v46  ;;  %v220_v50 = vpop.f32.mrb[1].mxu1 }
 0x1c5   :  { %v221_v52 = vadd.f32 %v220_v50, %v152_v44  ;;  %v348_v53 = vpop.f32.mrb[2].mxu1 }
 0x1c6   :  { %vm237_vm6 = vcmp.ge.f32.partialorder %v229_v49, 0.0  ;;  %v241_v54 = vmul.f32 0.01, %v229_v49  ;;  %v232_v55 = vadd.f32 %v348_v53, %v167_v47  ;;  %v223_v56 = vpop.f32.mrb[3].mxu1 }
 0x1c7   :  { %vm235_vm7 = vcmp.ge.f32.partialorder %v221_v52, 0.0  ;;  %v239_v58 = vmul.f32 0.01, %v221_v52  ;;  %v224_v59 = vadd.f32 %v223_v56, %v157_v45 }
 0x1c8   :  { %vm238_vm8 = vcmp.ge.f32.partialorder %v232_v55, 0.0  ;;  %v242_v60 = vmul.f32 0.01, %v232_v55  ;;  %v245_v61 = vsel %vm237_vm6, %v229_v49, %v241_v54 }
 0x1c9   :  { %v243_v62 = vsel %vm235_vm7, %v221_v52, %v239_v58  ;;  %vm236_vm9 = vcmp.ge.f32.partialorder %v224_v59, 0.0  ;;  %v240_v63 = vmul.f32 0.01, %v224_v59  ;;  %v274_v4 = vmul.f32 %v265_v1, %v245_v61 }
 0x1ca   :  { %v272_v0 = vmul.f32 %v255_v51, %v243_v62  ;;  %v246_v2 = vsel %vm238_vm8, %v232_v55, %v242_v60 }
 0x1cb   :  { %v244_v3 = vsel %vm236_vm9, %v224_v59, %v240_v63  ;;  %v275_v8 = vmul.f32 %v270_v6, %v246_v2  ;;  %v280_v11 = vsel %vm276_vm10, %v274_v4, 0.0 }
 0x1cc   :  { %v273_v5 = vmul.f32 %v260_v57, %v244_v3  ;;  %v277_v7 = vsel %vm276_vm10, %v272_v0, 0.0 }
 0x1cd   :  { %v282_v13 = vsel %vm276_vm10, %v275_v8, 0.0 }
 0x1ce   :  { %v278_v9 = vsel %vm276_vm10, %v273_v5, 0.0 }
 0x1cf   :  { %v279_v10 = vadd.f32 %v278_v9, %v277_v7 }
 0x1d1   :  { %v281_v12 = vadd.f32 %v280_v11, %v279_v10 }
 0x1d3   :  { %v283_v15 = vadd.f32 %v282_v13, %v281_v12 }
 0x1d5   :  { %v284_v16 = vrot.slane %v283_v15, 4 }
 0x1d7   :  { %v285_v18 = vadd.f32 %v284_v16, %v283_v15 }
 0x1d9   :  { %v286_v19 = vrot.slane %v285_v18, 2 }
 0x1db   :  { %v287_v21 = vadd.f32 %v286_v19, %v285_v18 }
 0x1dd   :  { %v288_v23 = vrot.slane %v287_v21, 1 }
 0x1df   :  { %v289_v25 = vadd.f32 %v288_v23, %v287_v21 }
 0x1e1   :  { %v299_v26 = vadd.f32 %v298_v24, %v289_v25 }
 0x1e3   :  { %v300_v27 = vmul.f32 0.5, %v299_v26 }
 0x1e5   :  { %357 = vtanh.f32 %v300_v27 }
 0x1ef   :  { %v358_v28 = vpop.eup %357 }
 0x1f0   :  { %v302_v29 = vmul.f32 0.5, %v358_v28 }
 0x1f2   :  { %v303_v30 = vadd.f32 0.5, %v302_v29 }
 0x1f4   :  { %305 = vst.msk [vmem:[#allocation3] sm:$0x1] %vm304_vm11, %v303_v30 }
 0x1f5   :  { %370 = shalt.err (!%p367_p4)
}
 0x1f6   :  { %s371_s13 = scalar_lea.hbm %s505_s7, 16 }
 0x1f7   :  { %p372_p5 = scmp.ne.s32.totalorder %s505_s7, %s371_s13  ;;  %p375_p6 = scmp.lt.u32.totalorder %s371_s13, %s505_s7 }
 0x1f9   :  { %p377_p7 = pnand %p375_p6, %p372_p5 }
 0x1fb   :  { %380 = shalt.err (!%p377_p7)
}
 0x1fc   :  { %315 = dma.vmem_to_hbm [thread:$0]  %s313_s6, 16, %s505_s7, [#allocation4]  }
 0x1fd   :  { %381 = dma.done.wait [#allocation4], 16  }
 0x1fe   :  { %382 = vsyncadd [#allocation4], 4294967280 }
 0x1ff   :  { %319 = vsyncpa [#allocation4], 1 }

</bundles_post_ra>
